<compile_context>
chip_gen: v7x
topology: tpu7x:2x2x1
jax: 0.10.0
libtpu: 0.0.40
codegen_flags: <defaults>
</compile_context>

<pallas_src>
import functools

import jax
import jax.numpy as jnp
from jax.experimental import pallas as pl
from jax.experimental.pallas import tpu as pltpu


# ---------------------------------------------------------------------------
# Pass 1: channel reduction on the MXU.
#   planes[t, :] = sum_c w_taps[t, c] * x[c, :]      (t = kh*3 + kw)
# Accumulated over channel chunks (innermost grid axis) directly in the f32
# output block, which stays VMEM-resident across that axis.
# ---------------------------------------------------------------------------
def _tap_planes_kernel(x_ref, w_ref, o_ref):
    # x_ref: (1, TC, HWS)  input chunk (native dtype)
    # w_ref: (9, TC)       tap-weight matrix (same dtype as x)
    # o_ref: (1, 9, HWS)   f32 accumulator / output
    planes = jnp.dot(w_ref[...], x_ref[0],
                     preferred_element_type=jnp.float32)

    @pl.when(pl.program_id(2) == 0)
    def _():
        o_ref[0] = planes

    @pl.when(pl.program_id(2) != 0)
    def _():
        o_ref[0] = o_ref[0] + planes


# ---------------------------------------------------------------------------
# Pass 2: tap combine + bias + bilinear resize (align_corners=True), all MXU.
#   out = sum_{kh,kw} Bh[kh] @ P[kh,kw] @ BwT[kw] + bias
# ---------------------------------------------------------------------------
def _combine_resize_kernel(p_ref, bh_ref, bwt_ref, bias_ref, o_ref,
                           *, w_side_first):
    # p_ref:   (1, 9, H, W)  f32 tap planes
    # bh_ref:  (3, Ho, H)    f32 row matrices (interp + tap shift + zero pad)
    # bwt_ref: (3, W, Wo)    f32 col matrices, pre-transposed
    # bias_ref:(1,)          f32 scalar (SMEM)
    # o_ref:   (1, 1, Ho, Wo)
    out = None
    if w_side_first:
        # sum_kh Bh[kh] @ ( sum_kw P[kh,kw] @ BwT[kw] )
        for kh in range(3):
            u = None
            for kw in range(3):
                d = jnp.dot(p_ref[0, kh * 3 + kw], bwt_ref[kw],
                            preferred_element_type=jnp.float32)
                u = d if u is None else u + d
            v = jnp.dot(bh_ref[kh], u, preferred_element_type=jnp.float32)
            out = v if out is None else out + v
    else:
        # sum_kw ( sum_kh Bh[kh] @ P[kh,kw] ) @ BwT[kw]
        for kw in range(3):
            t = None
            for kh in range(3):
                d = jnp.dot(bh_ref[kh], p_ref[0, kh * 3 + kw],
                            preferred_element_type=jnp.float32)
                t = d if t is None else t + d
            v = jnp.dot(t, bwt_ref[kw], preferred_element_type=jnp.float32)
            out = v if out is None else out + v
    o_ref[0, 0] = (out + bias_ref[0]).astype(o_ref.dtype)


# ---------------------------------------------------------------------------
# Bilinear interpolation matrix (align_corners=True), built in f32.
# ---------------------------------------------------------------------------
def _interp_matrix(n_out, n_in):
    """Row-stochastic (n_out, n_in) bilinear matrix, align_corners=True."""
    if n_in == 1:
        return jnp.ones((n_out, 1), jnp.float32)
    if n_out == 1:
        pos = jnp.zeros((1,), jnp.float32)   # single sample -> pixel 0
    else:
        pos = jnp.arange(n_out, dtype=jnp.float32) * (n_in - 1) / (n_out - 1)
    lo = jnp.clip(jnp.floor(pos).astype(jnp.int32), 0, n_in - 2)
    frac = pos - lo.astype(jnp.float32)
    rows = jnp.arange(n_out)
    m = jnp.zeros((n_out, n_in), jnp.float32)
    m = m.at[rows, lo].add(1.0 - frac)
    m = m.at[rows, lo + 1].add(frac)
    return m


def _pick_channel_tile(C):
    # BlockSpec constraint: TC must be a multiple of 128 or equal to C.
    if C > 128 and C % 128 == 0:
        return 128
    return C


def _pick_spatial_split(HW):
    # Optional 128-aligned split of the flattened spatial axis: extra parallel
    # grid steps for pipelining / the 2nd TensorCore when B is small.
    for ns in (4, 2):
        if HW % (ns * 128) == 0 and (HW // ns) >= 512:
            return ns
    return 1


# ---------------------------------------------------------------------------
# ScoreLayer forward
# ---------------------------------------------------------------------------
def score_layer(x, weight, bias, x_size=None):
    """Conv2d(C, 1, 3, 1, 1) (+ optional bilinear align_corners resize), NCHW."""
    B, C, H, W = x.shape
    HW = H * W

    # (1, C, 3, 3) -> (9, C): row t = kh*3 + kw, column c.
    w_taps = jnp.transpose(weight.reshape(C, 9), (1, 0)).astype(x.dtype)

    TC = _pick_channel_tile(C)
    NC = C // TC
    NS = _pick_spatial_split(HW)
    HWS = HW // NS

    vmem_limit = 32 * 1024 * 1024

    # ----- Pass 1: 9 tap planes via one MXU matmul per (b, s, c) step. -----
    planes = pl.pallas_call(
        _tap_planes_kernel,
        out_shape=jax.ShapeDtypeStruct((B, 9, HW), jnp.float32),
        grid=(B, NS, NC),
        in_specs=[
            pl.BlockSpec((1, TC, HWS), lambda b, s, c: (b, c, s)),
            pl.BlockSpec((9, TC), lambda b, s, c: (0, c)),
        ],
        out_specs=pl.BlockSpec((1, 9, HWS), lambda b, s, c: (b, 0, s)),
        compiler_params=pltpu.CompilerParams(
            dimension_semantics=("parallel", "parallel", "arbitrary"),
            vmem_limit_bytes=vmem_limit,
        ),
    )(x.reshape(B, C, HW), w_taps)

    planes = planes.reshape(B, 9, H, W)   # free reshape of contiguous HBM

    # ----- Interp matrices with the tap shifts / zero padding absorbed. -----
    if x_size is None:
        Ho, Wo = H, W
        a_h = jnp.eye(H, dtype=jnp.float32)
        a_w = jnp.eye(W, dtype=jnp.float32)
    else:
        Ho, Wo = int(x_size[2]), int(x_size[3])
        a_h = _interp_matrix(Ho, H)
        a_w = _interp_matrix(Wo, W)

    bh = jnp.stack([a_h @ jnp.eye(H, k=d, dtype=jnp.float32)
                    for d in (-1, 0, 1)])                         # (3, Ho, H)
    bwt = jnp.stack([(a_w @ jnp.eye(W, k=d, dtype=jnp.float32)).T
                     for d in (-1, 0, 1)])                        # (3, W, Wo)

    # Pick the cheaper matmul grouping (contraction-order choice).
    cost_w_first = 9 * H * W * Wo + 3 * Ho * H * Wo
    cost_h_first = 9 * Ho * H * W + 3 * Ho * W * Wo
    kernel2 = functools.partial(_combine_resize_kernel,
                                w_side_first=cost_w_first <= cost_h_first)

    # ----- Pass 2: combine + bias + resize. -----
    return pl.pallas_call(
        kernel2,
        out_shape=jax.ShapeDtypeStruct((B, 1, Ho, Wo), x.dtype),
        grid=(B,),
        in_specs=[
            pl.BlockSpec((1, 9, H, W), lambda b: (b, 0, 0, 0)),
            pl.BlockSpec((3, Ho, H), lambda b: (0, 0, 0)),
            pl.BlockSpec((3, W, Wo), lambda b: (0, 0, 0)),
            pl.BlockSpec(memory_space=pltpu.MemorySpace.SMEM),
        ],
        out_specs=pl.BlockSpec((1, 1, Ho, Wo), lambda b: (b, 0, 0, 0)),
        compiler_params=pltpu.CompilerParams(
            dimension_semantics=("parallel",),
            vmem_limit_bytes=vmem_limit,
        ),
    )(planes, bh, bwt, bias.reshape(1).astype(jnp.float32))


if __name__ == "__main__":
    key = jax.random.PRNGKey(0)
    k1, k2, k3 = jax.random.split(key, 3)

    # --- Config 1: matches the module's typical small-scale test. ---
    B, C, H, W = 2, 4, 16, 16
    x = jax.random.normal(k1, (B, C, H, W), jnp.float32)
    weight = 0.1 * jax.random.normal(k2, (1, C, 3, 3), jnp.float32)
    bias = 0.1 * jax.random.normal(k3, (1,), jnp.float32)
    x_size = (B, C, 24, 24)          # only x_size[2:] is used

    out = jax.block_until_ready(score_layer(x, weight, bias, x_size=x_size))
    out_nores = jax.block_until_ready(score_layer(x, weight, bias))

    ref_conv = jax.lax.conv_general_dilated(
        x, weight, window_strides=(1, 1), padding=((1, 1), (1, 1)),
        dimension_numbers=("NCHW", "OIHW", "NCHW"),
        precision=jax.lax.Precision.HIGHEST) + bias.reshape(1, 1, 1, 1)
    ah = _interp_matrix(24, H)
    aw = _interp_matrix(24, W)
    ref = jnp.einsum("oh,bchw,pw->bcop", ah, ref_conv, aw,
                     precision=jax.lax.Precision.HIGHEST)

    assert out.shape == (B, 1, 24, 24), out.shape
    assert out_nores.shape == (B, 1, H, W), out_nores.shape
    assert jnp.allclose(out_nores, ref_conv, atol=2e-4, rtol=2e-4)
    assert jnp.allclose(out, ref, atol=2e-4, rtol=2e-4)

    # --- Config 2: exercises channel chunking (C > 128) + anisotropic resize. ---
    B2, C2, H2, W2 = 1, 256, 16, 16
    x2 = jax.random.normal(k1, (B2, C2, H2, W2), jnp.float32)
    w2 = 0.05 * jax.random.normal(k2, (1, C2, 3, 3), jnp.float32)
    b2 = 0.1 * jax.random.normal(k3, (1,), jnp.float32)
    out2 = jax.block_until_ready(
        score_layer(x2, w2, b2, x_size=(B2, C2, 20, 28)))
    ref_conv2 = jax.lax.conv_general_dilated(
        x2, w2, window_strides=(1, 1), padding=((1, 1), (1, 1)),
        dimension_numbers=("NCHW", "OIHW", "NCHW"),
        precision=jax.lax.Precision.HIGHEST) + b2.reshape(1, 1, 1, 1)
    ref2 = jnp.einsum("oh,bchw,pw->bcop",
                      _interp_matrix(20, H2), ref_conv2, _interp_matrix(28, W2),
                      precision=jax.lax.Precision.HIGHEST)
    assert out2.shape == (B2, 1, 20, 28), out2.shape
    assert jnp.allclose(out2, ref2, atol=2e-3, rtol=2e-3)

    print("KERNEL_OK")
</pallas_src>

<mosaic_0001>
module attributes {stable_mosaic.version = 11 : i64} {
  func.func @_tap_planes_kernel(%arg0: i32, %arg1: i32, %arg2: i32, %arg3: memref<1x4x256xf32, #tpu.memory_space<vmem>>, %arg4: memref<9x4xf32, #tpu.memory_space<vmem>>, %arg5: memref<1x9x256xf32, #tpu.memory_space<vmem>>) attributes {dimension_semantics = [#tpu.dimension_semantics<parallel>, #tpu.dimension_semantics<parallel>, #tpu.dimension_semantics<arbitrary>], iteration_bounds = array<i64: 2, 1, 1>, scalar_prefetch = 0 : i64, scratch_operands = 0 : i64, tpu.core_type = #tpu.core_type<tc>, window_params = [{transform_indices = @transform_0, window_bounds = array<i64: 1, 4, 256>}, {transform_indices = @transform_1, window_bounds = array<i64: 9, 4>}, {transform_indices = @transform_2, window_bounds = array<i64: 1, 9, 256>}]} {
    %c0 = arith.constant 0 : index
    %c0_0 = arith.constant 0 : index
    %0 = vector.load %arg4[%c0, %c0_0] : memref<9x4xf32, #tpu.memory_space<vmem>>, vector<9x4xf32>
    %c0_1 = arith.constant 0 : index
    %c0_2 = arith.constant 0 : index
    %c0_3 = arith.constant 0 : index
    %1 = vector.load %arg3[%c0_1, %c0_2, %c0_3] : memref<1x4x256xf32, #tpu.memory_space<vmem>>, vector<1x4x256xf32>
    %2 = vector.shape_cast %1 : vector<1x4x256xf32> to vector<4x256xf32>
    %cst = arith.constant dense<0.000000e+00> : vector<9x256xf32>
    %3 = tpu.matmul %0, %2, %cst {dimension_numbers = #tpu.dot_dimension_numbers<[1], [0], [0], [1], [0, 0, 1, 1], [], []>} : vector<9x4xf32>, vector<4x256xf32>, vector<9x256xf32> -> vector<9x256xf32>
    %c0_i32 = arith.constant 0 : i32
    %4 = arith.cmpi eq, %arg2, %c0_i32 : i32
    %5 = arith.extui %4 : i1 to i32
    %c0_i32_4 = arith.constant 0 : i32
    %6 = arith.cmpi ne, %5, %c0_i32_4 : i32
    scf.if %6 {
      %c0_7 = arith.constant 0 : index
      %c0_8 = arith.constant 0 : index
      %c0_9 = arith.constant 0 : index
      %10 = vector.load %arg5[%c0_7, %c0_8, %c0_9] : memref<1x9x256xf32, #tpu.memory_space<vmem>>, vector<1x9x256xf32>
      %11 = vector.shape_cast %10 : vector<1x9x256xf32> to vector<9x256xf32>
      %12 = vector.shape_cast %3 : vector<9x256xf32> to vector<1x9x256xf32>
      tpu.vector_store %arg5[%c0_7, %c0_8, %c0_9], %12 {strides = array<i32>} : memref<1x9x256xf32, #tpu.memory_space<vmem>>, vector<1x9x256xf32>,
    } else {
    }
    %c0_i32_5 = arith.constant 0 : i32
    %7 = arith.cmpi ne, %arg2, %c0_i32_5 : i32
    %8 = arith.extui %7 : i1 to i32
    %c0_i32_6 = arith.constant 0 : i32
    %9 = arith.cmpi ne, %8, %c0_i32_6 : i32
    scf.if %9 {
      %c0_7 = arith.constant 0 : index
      %c0_8 = arith.constant 0 : index
      %c0_9 = arith.constant 0 : index
      %10 = vector.load %arg5[%c0_7, %c0_8, %c0_9] : memref<1x9x256xf32, #tpu.memory_space<vmem>>, vector<1x9x256xf32>
      %11 = vector.shape_cast %10 : vector<1x9x256xf32> to vector<9x256xf32>
      %12 = arith.addf %11, %3 : vector<9x256xf32>
      %c0_10 = arith.constant 0 : index
      %c0_11 = arith.constant 0 : index
      %c0_12 = arith.constant 0 : index
      %13 = vector.load %arg5[%c0_10, %c0_11, %c0_12] : memref<1x9x256xf32, #tpu.memory_space<vmem>>, vector<1x9x256xf32>
      %14 = vector.shape_cast %13 : vector<1x9x256xf32> to vector<9x256xf32>
      %15 = vector.shape_cast %12 : vector<9x256xf32> to vector<1x9x256xf32>
      tpu.vector_store %arg5[%c0_10, %c0_11, %c0_12], %15 {strides = array<i32>} : memref<1x9x256xf32, #tpu.memory_space<vmem>>, vector<1x9x256xf32>,
    } else {
    }
    return
  }
  func.func @transform_0(%arg0: i32, %arg1: i32, %arg2: i32) -> (i32, i32, i32) {
    %c0_i32 = arith.constant 0 : i32
    return %arg0, %arg2, %arg1 : i32, i32, i32
  }
  func.func @transform_1(%arg0: i32, %arg1: i32, %arg2: i32) -> (i32, i32) {
    %c0_i32 = arith.constant 0 : i32
    %c0_i32_0 = arith.constant 0 : i32
    return %c0_i32, %arg2 : i32, i32
  }
  func.func @transform_2(%arg0: i32, %arg1: i32, %arg2: i32) -> (i32, i32, i32) {
    %c0_i32 = arith.constant 0 : i32
    %c0_i32_0 = arith.constant 0 : i32
    return %arg0, %c0_i32, %arg1 : i32, i32, i32
  }
}

</mosaic_0001>

<bundles_post_ra>
// kernel: tpu_custom_call.1
= control target key start
LH: loop header
LB: loop body
LE: loop exit
PB: predicated region body
PF: predicated region fallthrough
CT: control target
= control target key end

     0   :  { %s536_s9 = smov 0   ;;  %s538_s10 = smov 0   ;;  %s575_s0 = inlined_call_operand.vmem [shape: f32[2,4,256], index: 0, kind: input, shape index: {}]   ;;  %s576_s1 = inlined_call_operand.vmem [shape: f32[9,4], index: 1, kind: input, shape index: {}]   ;;  %s577_s2 = inlined_call_operand.vmem [shape: f32[2,9,256], index: 2, kind: output, shape index: {}]  }
   0x1   :  { %s540_s11 = smov 0  }
   0x2 LB: > { %s31_s12 = sadd.s32 1, %s514_s10  ;;  %p455_p0 = scmp.ge.s32.totalorder %s518_s11, 1  ;;  %s518_s11 = sphi %s540_s11, %s12_s11   ;;  %s514_s10 = sphi %s538_s10, %s579_s10   ;;  %s510_s9 = sphi %s536_s9, %s578_s9  }
   0x3   : > { %p33_p1 = scmp.ge.s32.totalorder %s31_s12, 2  ;;  %p155_p2 = scmp.lt.s32.totalorder %s518_s11, 3 }
   0x5   : > { %s581_s12 = smov (%p33_p1, %s31_s12), 0  ;;  %p156_p3 = pnand %p455_p0, %p155_p2 }
   0x6   : > { %p194_p4 = scmp.lt.s32.totalorder (!%p156_p3), %s510_s9, 1  ;;  %v520_v0 = vmov (!%p156_p3), 0.0   ;;  %vm233_vm0 = vcmask (!%p156_p3), 1043456   ;;  %v221_v3 = vld [vmem:[%s576_s1] sm:$0xff] (!%p156_p3)  ;;  %vm226_vm1 = vcmask (!%p156_p3), 31744  }
   0x7   : > { %159 = sbr.rel (%p156_p3) target bundleno = 236 (0xec), region = 28  ;;  %302 = vmatprep.mubr.f32.mxu0 (!%p156_p3), %v520_v0  ;;  %308 = vmatprep.mubr.f32.mxu1 (!%p156_p3), %v520_v0  ;;  %v222_v4 = vld [vmem:[%s576_s1 + $0x8] sm:$0x1] (!%p156_p3) }
   0xe   : > { %s583_s9 = smov (!%p194_p4, %s510_s9), 1 }
   0xf   : > { %s466_s13 = sshll.u32 %s583_s9, 3  ;;  %s467_s21 = sshll.u32 %s583_s9, 5 }
  0x10   : > { %s205_s16 = scalar_lea.vmem %s575_s0, %s466_s13  ;;  %s219_s24 = scalar_lea.vmem %s577_s2, %s467_s21 }
  0x11   : > { %v223_v1 = vld [vmem:[%s205_s16] sm:$0xff] }
  0x12   : > { %v225_v2 = vcombine.high %v223_v1, %v223_v1 }
  0x14   : > { %460 = vmatprep.subr.msk.mxu0 %vm233_vm0, %v225_v2  ;;  %468 = vmatprep.subr.msk.mxu1 %vm233_vm0, %v225_v2 }
  0x15   : > { %461 = vmatpush1.msk.msra.mxu0 %vm233_vm0, %v223_v1  ;;  %469 = vmatpush1.msk.msra.mxu1 %vm233_vm0, %v223_v1 }
  0x16   : > { %462 = vmatmul.mubr.msk.f32.vlgmr.msra.gmra.mrb[0].mxu0 %vm226_vm1, %v221_v3  ;;  %463 = vmatmul.mubr.msk.f32.vlgmr.msra.gmra.mrb[0].mxu1 %vm226_vm1, %v222_v4 }
  0xe9   : > { %v304_v5 = vpop.f32.mrb[0].mxu0  ;;  %v310_v6 = vpop.f32.mrb[0].mxu1 }
  0xea   : > { %319 = vst [vmem:[%s219_s24] sm:$0xff] %v304_v5  ;;  %321 = vst [vmem:[%s219_s24 + $0x10] sm:$0x1] %v310_v6  ;;  %v306_v7 = vpop.f32.mrb[1].mxu0  ;;  %v312_v8 = vpop.f32.mrb[1].mxu1 }
  0xeb   : > { %320 = vst [vmem:[%s219_s24 + $0x8] sm:$0xff] %v306_v7  ;;  %322 = vst [vmem:[%s219_s24 + $0x18] sm:$0x1] %v312_v8 }
  0xec PF: > { %s12_s11 = sadd.s32 1, %s518_s11   ;;  %s578_s9 = smov %s514_s10 }
  0xed   : > { %p9_p5 = scmp.ge.s32.totalorder %s12_s11, 4   ;;  %s579_s10 = smov %s581_s12 }
  0xef   :  { %11 = sbr.rel (!%p9_p5) target bundleno = 2 (0x2), region = 69 }

</bundles_post_ra>
